<compile_context>
chip_gen: v5e
topology: v5e:2x2
jax: 0.10.0
libtpu: 0.0.40
codegen_flags: <defaults>
</compile_context>

<pallas_src>
import jax
import jax.numpy as jnp
from jax import lax
from jax.experimental import pallas as pl
from jax.experimental.pallas import tpu as pltpu

# Module hyper-parameters (scaled down from embed_dim=256 / maxlen=80 / vocab=20000
# to small, TPU-tile-friendly synthetic sizes).
VOCAB_SIZE = 256
MAXLEN = 16
EMBED_DIM = 128

BATCH = 2
SEQ_LEN = 8  # must be <= MAXLEN


def _tok_pos_emb_kernel(ids_ref, pos_ids_ref, tok_ref, pos_ref, out_ref):
    # ids_ref     : (TR, 1) int32   -- flattened token ids for this row tile
    # pos_ids_ref : (TR, 1) int32   -- flattened position indices (r % L) for this row tile
    # tok_ref     : (V, D)  float32 -- full token embedding table
    # pos_ref     : (MAXLEN, D) float32 -- full positional embedding table
    # out_ref     : (TR, D) float32
    tr = out_ref.shape[0]
    v = tok_ref.shape[0]
    maxlen = pos_ref.shape[0]

    ids = ids_ref[...]          # (TR, 1)
    pids = pos_ids_ref[...]     # (TR, 1)

    # Lane-dense one-hots: vocab / position index lives on the 128-wide lane axis.
    iota_v = lax.broadcasted_iota(jnp.int32, (tr, v), 1)        # (TR, V)
    onehot_tok = (iota_v == ids).astype(jnp.float32)            # (TR, V)

    iota_p = lax.broadcasted_iota(jnp.int32, (tr, maxlen), 1)   # (TR, MAXLEN)
    onehot_pos = (iota_p == pids).astype(jnp.float32)           # (TR, MAXLEN)

    # Gather-as-matmul on the MXU, standard (M,K)x(K,N) orientation (no transposed feed).
    tok_emb = jnp.dot(onehot_tok, tok_ref[...],
                      preferred_element_type=jnp.float32)       # (TR, D)
    pos_emb = jnp.dot(onehot_pos, pos_ref[...],
                      preferred_element_type=jnp.float32)       # (TR, D)

    out_ref[...] = (tok_emb + pos_emb).astype(out_ref.dtype)


def token_and_position_embedding(ids, tok_table, pos_table, *, max_tile_rows=128):
    """ids: (B, L) int32; tok_table: (V, D); pos_table: (MAXLEN, D) -> (B, L, D)."""
    B, L = ids.shape
    V, D = tok_table.shape
    maxlen = pos_table.shape[0]
    assert L <= maxlen

    # Flatten (B, L) -> R rows; positions for flattened row r = r % L.
    R = B * L
    ids_flat = ids.reshape(R).astype(jnp.int32)
    pos_flat = jnp.tile(jnp.arange(L, dtype=jnp.int32), B)      # (R,)

    # Row tile: up to 128 rows (MXU-row / f32-sublane friendly); pad R to a tile multiple.
    r_pad8 = -(-R // 8) * 8
    tr = min(max_tile_rows, r_pad8)          # multiple of 8 by construction
    R_pad = -(-R // tr) * tr
    pad = R_pad - R
    if pad:
        ids_flat = jnp.concatenate([ids_flat, jnp.zeros((pad,), jnp.int32)])
        pos_flat = jnp.concatenate([pos_flat, jnp.zeros((pad,), jnp.int32)])

    # (rows, 1) layout so the in-kernel compare broadcasts along lanes with no relayout.
    ids2 = ids_flat.reshape(R_pad, 1)
    pos2 = pos_flat.reshape(R_pad, 1)

    grid = (R_pad // tr,)

    out_flat = pl.pallas_call(
        _tok_pos_emb_kernel,
        out_shape=jax.ShapeDtypeStruct((R_pad, D), tok_table.dtype),
        grid_spec=pltpu.PrefetchScalarGridSpec(
            num_scalar_prefetch=0,
            grid=grid,
            in_specs=[
                pl.BlockSpec((tr, 1), lambda t: (t, 0)),        # token ids for this tile
                pl.BlockSpec((tr, 1), lambda t: (t, 0)),        # position ids for this tile
                pl.BlockSpec((V, D), lambda t: (0, 0)),         # full token table (constant)
                pl.BlockSpec((maxlen, D), lambda t: (0, 0)),    # full pos table (constant)
            ],
            out_specs=pl.BlockSpec((tr, D), lambda t: (t, 0)),  # lane-dense output tile
        ),
        compiler_params=pltpu.CompilerParams(
            # Row tiles are independent -> megacore-splittable on v7x; no-op on v5e/v6e.
            dimension_semantics=("parallel",),
        ),
    )(ids2, pos2, tok_table, pos_table)

    return out_flat[:R].reshape(B, L, D)


if __name__ == "__main__":
    key = jax.random.PRNGKey(0)
    k_tok, k_pos, k_ids = jax.random.split(key, 3)

    # nn.Embedding default init ~ N(0, 1)
    tok_table = jax.random.normal(k_tok, (VOCAB_SIZE, EMBED_DIM), dtype=jnp.float32)
    pos_table = jax.random.normal(k_pos, (MAXLEN, EMBED_DIM), dtype=jnp.float32)
    ids = jax.random.randint(k_ids, (BATCH, SEQ_LEN), 0, VOCAB_SIZE, dtype=jnp.int32)

    out = token_and_position_embedding(ids, tok_table, pos_table)
    out = jax.block_until_ready(out)

    # Pure-JAX reference (exact PyTorch forward semantics)
    ref = tok_table[ids] + pos_table[:SEQ_LEN][None, :, :]

    assert out.shape == (BATCH, SEQ_LEN, EMBED_DIM)
    assert out.dtype == jnp.float32
    assert jnp.allclose(out, ref, atol=1e-5, rtol=1e-5)

    print("KERNEL_OK")
</pallas_src>

<mosaic_0001>
module attributes {stable_mosaic.version = 11 : i64} {
  func.func @_tok_pos_emb_kernel(%arg0: i32, %arg1: memref<16x1xi32, #tpu.memory_space<vmem>>, %arg2: memref<16x1xi32, #tpu.memory_space<vmem>>, %arg3: memref<256x128xf32, #tpu.memory_space<vmem>>, %arg4: memref<16x128xf32, #tpu.memory_space<vmem>>, %arg5: memref<16x128xf32, #tpu.memory_space<vmem>>) attributes {dimension_semantics = [#tpu.dimension_semantics<parallel>], iteration_bounds = array<i64: 1>, scalar_prefetch = 0 : i64, scratch_operands = 0 : i64, tpu.core_type = #tpu.core_type<tc>, window_params = [{transform_indices = @transform_0, window_bounds = array<i64: 16, 1>}, {transform_indices = @transform_1, window_bounds = array<i64: 16, 1>}, {pipeline_mode = #tpu.pipeline_mode<synchronous>, transform_indices = @transform_2, window_bounds = array<i64: 256, 128>}, {pipeline_mode = #tpu.pipeline_mode<synchronous>, transform_indices = @transform_3, window_bounds = array<i64: 16, 128>}, {transform_indices = @transform_4, window_bounds = array<i64: 16, 128>}]} {
    %c0 = arith.constant 0 : index
    %c0_0 = arith.constant 0 : index
    %0 = vector.load %arg1[%c0, %c0_0] : memref<16x1xi32, #tpu.memory_space<vmem>>, vector<16x1xi32>
    %c0_1 = arith.constant 0 : index
    %c0_2 = arith.constant 0 : index
    %1 = vector.load %arg2[%c0_1, %c0_2] : memref<16x1xi32, #tpu.memory_space<vmem>>, vector<16x1xi32>
    %2 = tpu.iota {dimensions = array<i32: 1>} : vector<16x256xi32>
    %3 = vector.broadcast %0 : vector<16x1xi32> to vector<16x256xi32>
    %4 = arith.cmpi eq, %2, %3 : vector<16x256xi32>
    %5 = arith.extui %4 : vector<16x256xi1> to vector<16x256xi32>
    %6 = arith.sitofp %5 : vector<16x256xi32> to vector<16x256xf32>
    %7 = tpu.iota {dimensions = array<i32: 1>} : vector<16x16xi32>
    %8 = vector.broadcast %1 : vector<16x1xi32> to vector<16x16xi32>
    %9 = arith.cmpi eq, %7, %8 : vector<16x16xi32>
    %10 = arith.extui %9 : vector<16x16xi1> to vector<16x16xi32>
    %11 = arith.sitofp %10 : vector<16x16xi32> to vector<16x16xf32>
    %c0_3 = arith.constant 0 : index
    %c0_4 = arith.constant 0 : index
    %12 = vector.load %arg3[%c0_3, %c0_4] : memref<256x128xf32, #tpu.memory_space<vmem>>, vector<256x128xf32>
    %cst = arith.constant dense<0.000000e+00> : vector<16x128xf32>
    %13 = tpu.matmul %6, %12, %cst {dimension_numbers = #tpu.dot_dimension_numbers<[1], [0], [0], [1], [0, 0, 1, 1], [], []>} : vector<16x256xf32>, vector<256x128xf32>, vector<16x128xf32> -> vector<16x128xf32>
    %c0_5 = arith.constant 0 : index
    %c0_6 = arith.constant 0 : index
    %14 = vector.load %arg4[%c0_5, %c0_6] : memref<16x128xf32, #tpu.memory_space<vmem>>, vector<16x128xf32>
    %cst_7 = arith.constant dense<0.000000e+00> : vector<16x128xf32>
    %15 = tpu.matmul %11, %14, %cst_7 {dimension_numbers = #tpu.dot_dimension_numbers<[1], [0], [0], [1], [0, 0, 1, 1], [], []>} : vector<16x16xf32>, vector<16x128xf32>, vector<16x128xf32> -> vector<16x128xf32>
    %16 = arith.addf %13, %15 : vector<16x128xf32>
    %c0_8 = arith.constant 0 : index
    %c0_9 = arith.constant 0 : index
    %17 = vector.load %arg5[%c0_8, %c0_9] : memref<16x128xf32, #tpu.memory_space<vmem>>, vector<16x128xf32>
    tpu.vector_store %arg5[%c0_8, %c0_9], %16 {strides = array<i32>} : memref<16x128xf32, #tpu.memory_space<vmem>>, vector<16x128xf32>,
    return
  }
  func.func @transform_0(%arg0: i32) -> (i32, i32) {
    %c0_i32 = arith.constant 0 : i32
    %c0_i32_0 = arith.constant 0 : i32
    return %arg0, %c0_i32 : i32, i32
  }
  func.func @transform_1(%arg0: i32) -> (i32, i32) {
    %c0_i32 = arith.constant 0 : i32
    %c0_i32_0 = arith.constant 0 : i32
    return %arg0, %c0_i32 : i32, i32
  }
  func.func @transform_2(%arg0: i32) -> (i32, i32) {
    %c0_i32 = arith.constant 0 : i32
    %c0_i32_0 = arith.constant 0 : i32
    %c0_i32_1 = arith.constant 0 : i32
    return %c0_i32, %c0_i32_0 : i32, i32
  }
  func.func @transform_3(%arg0: i32) -> (i32, i32) {
    %c0_i32 = arith.constant 0 : i32
    %c0_i32_0 = arith.constant 0 : i32
    %c0_i32_1 = arith.constant 0 : i32
    return %c0_i32, %c0_i32_0 : i32, i32
  }
  func.func @transform_4(%arg0: i32) -> (i32, i32) {
    %c0_i32 = arith.constant 0 : i32
    %c0_i32_0 = arith.constant 0 : i32
    return %arg0, %c0_i32 : i32, i32
  }
}

</mosaic_0001>

<bundles_post_ra>
// kernel: tpu_custom_call.1
= control target key start
LH: loop header
LB: loop body
LE: loop exit
PB: predicated region body
PF: predicated region fallthrough
CT: control target
= control target key end

     0   :  { %9 = vsyncpa [#allocation3], 0  ;;  %s371_s0 = inlined_call_operand.vmem [shape: s32[16,1], index: 0, kind: input, shape index: {}]   ;;  %s372_s1 = inlined_call_operand.vmem [shape: s32[16,1], index: 1, kind: input, shape index: {}]   ;;  %s373_s2 = inlined_call_operand.hbm [shape: f32[256,128], index: 2, kind: input, shape index: {}]   ;;  %s374_s3 = inlined_call_operand.vmem [shape: f32[16,128], index: 3, kind: input, shape index: {}]   ;;  %s375_s4 = inlined_call_operand.hbm [shape: f32[16,128], index: 4, kind: output, shape index: {}]  }
   0x1   :  { %10 = vsyncpa [#allocation4], 0  ;;  %s19_s17 = sshll.u32 %s373_s2, 4  ;;  %s307_s18 = smov [#allocation2]   ;;  %s20_s17 = int_to_ptr.hbm [resolvable:$true] %s19_s17 }
   0x2   :  { %s21_s19 = sshll.u32 %s307_s18, 4  ;;  %s308_s20 = smov 128   ;;  %s22_s19 = int_to_ptr.vmem [resolvable:$true] %s21_s19 }
   0x3   :  { %s309_s21 = smov 8  }
   0x4   :  { %27 = dma.hbm_to_vmem [thread:$0]  %s20_s17, 4096, %s22_s19, [#allocation3], %s308_s20, %s308_s20, %s309_s21  }
   0x5   :  { %303 = dma.done.wait [#allocation3], 4096  }
   0x6   :  { %304 = vsyncadd [#allocation3], 4294963200  ;;  %v310_v0 = vmov 0   ;;  %v36_v1 = vld [vmem:[%s372_s1] sm:$0xff]  ;;  %v35_v2 = vld [vmem:[%s371_s0 + $0x8] sm:$0xff]  ;;  %v38_v39 = vlaneseq  ;;  %vm105_vm0 = vcmask 130048  }
   0x7   :  { %254 = vset.pattern.permute.xlu1 %v310_v0  ;;  %253 = vset.pattern.permute.xlu0 %v310_v0  ;;  %v86_v3 = vld [vmem:[#allocation2 + $0x78] sm:$0xff]  ;;  %v85_v4 = vld [vmem:[#allocation2 + $0x70] sm:$0xff]  ;;  %v84_v7 = vld [vmem:[#allocation2 + $0x68] sm:$0xff]  ;;  %v311_v44 = vmov 0.0   ;;  %v312_v46 = vmov 1.0   ;;  %s189_s8 = sshll.u32 %s375_s4, 4  ;;  %s190_s8 = int_to_ptr.hbm [resolvable:$true] %s189_s8 }
   0x8   :  { %60 = vperm.xlu0 %253, %v36_v1   ;;  %45 = vperm.xlu1 %254, %v35_v2   ;;  %v102_v5 = vld [vmem:[#allocation2 + $0xf8] sm:$0xff]  ;;  %v101_v6 = vld [vmem:[#allocation2 + $0xf0] sm:$0xff]  ;;  %v100_v8 = vld [vmem:[#allocation2 + $0xe8] sm:$0xff]  ;;  %v39_v40 = vand.u32 127, %v38_v39 }
   0x9   :  { %214 = vmatpush.msra.mxu3 %v86_v3  ;;  %135 = vmatpush.msra.mxu1 %v86_v3  ;;  %v83_v9 = vld [vmem:[#allocation2 + $0x60] sm:$0xff]  ;;  %v104_v10 = vld [vmem:[%s374_s3 + $0x8] sm:$0xff]  ;;  %v82_v13 = vld [vmem:[#allocation2 + $0x58] sm:$0xff] }
   0xa   :  { %230 = vmatpush.msra.mxu2 %v102_v5  ;;  %v37_v11 = vld [vmem:[%s372_s1 + $0x8] sm:$0xff]  ;;  %v34_v12 = vld [vmem:[%s371_s0] sm:$0xff]  ;;  %126 = vmatpush.msra.mxu0 %v104_v10  ;;  %v81_v16 = vld [vmem:[#allocation2 + $0x50] sm:$0xff]  ;;  %v40_v41 = vadd.s32 128, %v39_v40  ;;  %s313_s0 = smov [#allocation5]  }
   0xb   :  { %215 = vmatpush.msra.mxu3 %v85_v4  ;;  %136 = vmatpush.msra.mxu1 %v85_v4  ;;  %v99_v14 = vld [vmem:[#allocation2 + $0xe0] sm:$0xff]  ;;  %v98_v17 = vld [vmem:[#allocation2 + $0xd8] sm:$0xff]  ;;  %v80_v18 = vld [vmem:[#allocation2 + $0x48] sm:$0xff]  ;;  %s187_s1 = sshll.u32 %s313_s0, 4  ;;  %s188_s1 = int_to_ptr.vmem [resolvable:$true] %s187_s1 }
   0xc   :  { %231 = vmatpush.msra.mxu2 %v101_v6  ;;  %v103_v15 = vld [vmem:[%s374_s3] sm:$0xff]  ;;  %v97_v19 = vld [vmem:[#allocation2 + $0xd0] sm:$0xff]  ;;  %v96_v21 = vld [vmem:[#allocation2 + $0xc8] sm:$0xff] }
   0xd   :  { %216 = vmatpush.msra.mxu3 %v84_v7  ;;  %137 = vmatpush.msra.mxu1 %v84_v7  ;;  %v79_v20 = vld [vmem:[#allocation2 + $0x40] sm:$0xff]  ;;  %v78_v22 = vld [vmem:[#allocation2 + $0x38] sm:$0xff]  ;;  %v77_v24 = vld [vmem:[#allocation2 + $0x30] sm:$0xff] }
   0xe   :  { %232 = vmatpush.msra.mxu2 %v100_v8  ;;  %127 = vmatpush.msra.mxu0 %v103_v15  ;;  %v95_v23 = vld [vmem:[#allocation2 + $0xc0] sm:$0xff]  ;;  %v94_v25 = vld [vmem:[#allocation2 + $0xb8] sm:$0xff]  ;;  %v76_v26 = vld [vmem:[#allocation2 + $0x28] sm:$0xff] }
   0xf   :  { %217 = vmatpush.msra.mxu3 %v83_v9  ;;  %138 = vmatpush.msra.mxu1 %v83_v9  ;;  %v93_v27 = vld [vmem:[#allocation2 + $0xb0] sm:$0xff]  ;;  %v75_v28 = vld [vmem:[#allocation2 + $0x20] sm:$0xff]  ;;  %v92_v29 = vld [vmem:[#allocation2 + $0xa8] sm:$0xff] }
  0x10   :  { %63 = vperm.xlu0 %253, %v37_v11   ;;  %42 = vperm.xlu1 %254, %v34_v12   ;;  %v74_v30 = vld [vmem:[#allocation2 + $0x18] sm:$0xff]  ;;  %v91_v31 = vld [vmem:[#allocation2 + $0xa0] sm:$0xff]  ;;  %v73_v32 = vld [vmem:[#allocation2 + $0x10] sm:$0xff] }
  0x11   :  { %218 = vmatpush.msra.mxu3 %v82_v13  ;;  %233 = vmatpush.msra.mxu2 %v99_v14  ;;  %v90_v33 = vld [vmem:[#allocation2 + $0x98] sm:$0xff]  ;;  %v72_v34 = vld [vmem:[#allocation2 + $0x8] sm:$0xff]  ;;  %v89_v35 = vld [vmem:[#allocation2 + $0x90] sm:$0xff] }
  0x12   :  { %139 = vmatpush.msra.mxu1 %v82_v13  ;;  %158 = vmatpush.msrb.mxu0 %v102_v5  ;;  %v71_v36 = vld [vmem:[#allocation2] sm:$0xff]  ;;  %v88_v37 = vld [vmem:[#allocation2 + $0x88] sm:$0xff] }
  0x13   :  { %219 = vmatpush.msra.mxu3 %v81_v16  ;;  %234 = vmatpush.msra.mxu2 %v98_v17  ;;  %v87_v38 = vld [vmem:[#allocation2 + $0x80] sm:$0xff] }
  0x14   :  { %140 = vmatpush.msra.mxu1 %v81_v16  ;;  %159 = vmatpush.msrb.mxu0 %v101_v6 }
  0x15   :  { %220 = vmatpush.msra.mxu3 %v80_v18  ;;  %235 = vmatpush.msra.mxu2 %v97_v19 }
  0x16   :  { %141 = vmatpush.msra.mxu1 %v80_v18  ;;  %160 = vmatpush.msrb.mxu0 %v100_v8 }
  0x17   :  { %221 = vmatpush.msra.mxu3 %v79_v20  ;;  %236 = vmatpush.msra.mxu2 %v96_v21 }
  0x18   :  { %142 = vmatpush.msra.mxu1 %v79_v20  ;;  %161 = vmatpush.msrb.mxu0 %v99_v14 }
  0x19   :  { %222 = vmatpush.msra.mxu3 %v78_v22  ;;  %237 = vmatpush.msra.mxu2 %v95_v23 }
  0x1a   :  { %143 = vmatpush.msra.mxu1 %v78_v22  ;;  %162 = vmatpush.msrb.mxu0 %v98_v17 }
  0x1b   :  { %223 = vmatpush.msra.mxu3 %v77_v24  ;;  %238 = vmatpush.msra.mxu2 %v94_v25 }
  0x1c   :  { %144 = vmatpush.msra.mxu1 %v77_v24  ;;  %163 = vmatpush.msrb.mxu0 %v97_v19 }
  0x1d   :  { %224 = vmatpush.msra.mxu3 %v76_v26  ;;  %239 = vmatpush.msra.mxu2 %v93_v27 }
  0x1e   :  { %145 = vmatpush.msra.mxu1 %v76_v26  ;;  %164 = vmatpush.msrb.mxu0 %v96_v21 }
  0x1f   :  { %225 = vmatpush.msra.mxu3 %v75_v28  ;;  %240 = vmatpush.msra.mxu2 %v92_v29 }
  0x20   :  { %146 = vmatpush.msra.mxu1 %v75_v28  ;;  %165 = vmatpush.msrb.mxu0 %v95_v23 }
  0x21   :  { %226 = vmatpush.msra.mxu3 %v74_v30  ;;  %241 = vmatpush.msra.mxu2 %v91_v31 }
  0x22   :  { %147 = vmatpush.msra.mxu1 %v74_v30  ;;  %166 = vmatpush.msrb.mxu0 %v94_v25 }
  0x23   :  { %227 = vmatpush.msra.mxu3 %v73_v32  ;;  %242 = vmatpush.msra.mxu2 %v90_v33 }
  0x24   :  { %148 = vmatpush.msra.mxu1 %v73_v32  ;;  %167 = vmatpush.msrb.mxu0 %v93_v27 }
  0x25   :  { %228 = vmatpush.msra.mxu3 %v72_v34  ;;  %243 = vmatpush.msra.mxu2 %v89_v35 }
  0x26   :  { %168 = vmatpush.msrb.mxu0 %v92_v29  ;;  %149 = vmatpush.msra.mxu1 %v72_v34 }
  0x27   :  { %229 = vmatpush.msra.mxu3 %v71_v36  ;;  %244 = vmatpush.msra.mxu2 %v88_v37 }
  0x28   :  { %169 = vmatpush.msrb.mxu0 %v91_v31  ;;  %150 = vmatpush.msra.mxu1 %v71_v36 }
  0x29   :  { %245 = vmatpush.msra.mxu2 %v87_v38 }
  0x2a   :  { %170 = vmatpush.msrb.mxu0 %v90_v33 }
  0x2c   :  { %171 = vmatpush.msrb.mxu0 %v89_v35 }
  0x2e   :  { %172 = vmatpush.msrb.mxu0 %v88_v37 }
  0x30   :  { %173 = vmatpush.msrb.mxu0 %v87_v38 }
  0x7a   :  { %v61_v42 = vpop.permute.xlu0 %60  ;;  %v46_v43 = vpop.permute.xlu1 %45 }
  0x7b   :  { %vm65_vm1 = vcmp.eq.s32.totalorder %v39_v40, %v61_v42  ;;  %vm49_vm2 = vcmp.eq.s32.totalorder %v39_v40, %v46_v43  ;;  %vm50_vm3 = vcmp.eq.s32.totalorder %v40_v41, %v46_v43 }
  0x7c   :  { %v206_v45 = vsel %vm65_vm1, 1.0, %v311_v44  ;;  %211 = vmatmul.msk.f32.vlgmr.msra.gmra.mxu3 %vm49_vm2, %v312_v46  ;;  %213 = vmatmul.msk.f32.vlgmr.msra.gmra.mxu2 %vm50_vm3, %v312_v46 }
  0x7d   :  { %208 = vmatmul.msk.f32.vlgmr.msra.gmra.mxu0 %vm105_vm0, %v206_v45 }
  0x82   :  { %v64_v47 = vpop.permute.xlu0 %63  ;;  %v43_v48 = vpop.permute.xlu1 %42 }
  0x83   :  { %vm66_vm4 = vcmp.eq.s32.totalorder %v39_v40, %v64_v47  ;;  %vm47_vm5 = vcmp.eq.s32.totalorder %v39_v40, %v43_v48  ;;  %vm48_vm6 = vcmp.eq.s32.totalorder %v40_v41, %v43_v48 }
  0x84   :  { %v207_v49 = vsel %vm66_vm4, 1.0, %v311_v44  ;;  %210 = vmatmul.msk.f32.vlgmr.msra.gmra.mxu1 %vm47_vm5, %v312_v46 }
  0x85   :  { %209 = vmatmul.msk.f32.gmra.mxu0 %vm105_vm0, %v207_v49 }
  0x8d   :  { %212 = vmatmul.msk.f32.vlgmr.msrb.gmra.mxu0 %vm48_vm6, %v312_v46 }
  0xfa   :  { %v129_v50 = vpop.f32.mrf.mxu0 }
  0xff   :  { %v155_v51 = vpop.f32.mrf.mxu3  ;;  %v178_v53 = vpop.f32.mrf.mxu2 }
 0x101   :  { %v152_v56 = vpop.f32.mrf.mxu1 }
 0x102   :  { %v132_v52 = vpop.f32.mrf.mxu0  ;;  %v153_v57 = vadd.f32 %v152_v56, %v129_v50 }
 0x103   :  { %v156_v54 = vadd.f32 %v155_v51, %v132_v52 }
 0x105   :  { %v179_v55 = vadd.f32 %v178_v53, %v156_v54 }
 0x107   :  { %182 = vst [vmem:[#allocation5 + $0x8] sm:$0xff] %v179_v55 }
 0x10a   :  { %v175_v58 = vpop.f32.mrf.mxu0 }
 0x10b   :  { %v176_v59 = vadd.f32 %v175_v58, %v153_v57 }
 0x10d   :  { %181 = vst [vmem:[#allocation5] sm:$0xff] %v176_v59 }
 0x10e   :  { %195 = dma.vmem_to_hbm [thread:$0]  %s188_s1, 256, %s190_s8, [#allocation4], %s308_s20, %s308_s20, %s309_s21  }
 0x10f   :  { %305 = dma.done.wait [#allocation4], 256  }
 0x110   :  { %306 = vsyncadd [#allocation4], 4294967040 }
 0x111   :  { %200 = vsyncpa [#allocation3], 1 }
 0x112   :  { %201 = vsyncpa [#allocation4], 1 }

</bundles_post_ra>
